<compile_context>
chip_gen: v7x
topology: tpu7x:2x2x1
jax: 0.10.0
libtpu: 0.0.40
codegen_flags: <defaults>
</compile_context>

<pallas_src>
import math

import jax
import jax.numpy as jnp
from jax.experimental import pallas as pl
from jax.experimental.pallas import tpu as pltpu


# ----------------------------------------------------------------------------- kernels
def _pool_kernel(x_ref, csum_ref, colsum_ref):
    # x_ref: (ct, HW) block of one batch item (lane-dense flattened spatial axis).
    x = x_ref[...].astype(jnp.float32)
    csum_ref[...] = jnp.sum(x, axis=-1, keepdims=True)      # per-channel sum   -> (ct, 1)
    part = jnp.sum(x, axis=0, keepdims=True)                 # channel-tile sum  -> (1, HW)

    @pl.when(pl.program_id(1) == 0)
    def _():
        colsum_ref[...] = part

    @pl.when(pl.program_id(1) > 0)
    def _():
        colsum_ref[...] = colsum_ref[...] + part


def _gate_kernel(x_ref, sp_ref, scale_ref, shift_ref, o_ref):
    # x_ref: (ct, HW); sp_ref: (1, HW) f32; scale/shift: (ct, 1) f32.
    # Sigmoid in f32 (EUP); final multiply in the input dtype (bf16-native on v6e/v7x;
    # a no-op cast for f32 inputs, emulated-but-correct on v5e).
    att = jax.nn.sigmoid(scale_ref[...] * sp_ref[...] + shift_ref[...])
    o_ref[...] = (x_ref[...] * att.astype(x_ref.dtype)).astype(o_ref.dtype)


# ----------------------------------------------------------------------------- tiling helpers
def _round_up(a, m):
    return (a + m - 1) // m * m


def _sublane_mult(itemsize):
    # Sublane tile height: f32 -> 8, bf16 -> 16, int8/fp8 -> 32.
    return 8 * max(1, 4 // max(1, itemsize))


def _padded_block_bytes(rows, cols, itemsize):
    return _round_up(rows, _sublane_mult(itemsize)) * _round_up(cols, 128) * itemsize


def _vmem_need_bytes(ct, hw, itemsize):
    """Padded VMEM footprint of the worst pass (the gate pass): double-buffered x input
    and output blocks, the small broadcast operands, plus one f32 block of slack for
    in-kernel upcast temporaries."""
    x_blk = _padded_block_bytes(ct, hw, itemsize)
    f32_blk = _padded_block_bytes(ct, hw, 4)
    small = (2 * _padded_block_bytes(1, hw, 4)      # sp / colsum blocks
             + 4 * _padded_block_bytes(ct, 1, 4))   # scale, shift / csum blocks
    return 2 * x_blk + 2 * x_blk + f32_blk + 2 * small + (1 << 20)


def _tpu_vmem_capacity():
    try:
        cap = int(getattr(pltpu.get_tpu_info(), "vmem_capacity_bytes"))
        if cap > 0:
            return cap
    except Exception:
        pass
    return 64 << 20                                  # conservative fallback (v7x per-TC)


def _pick_c_tile(batch, channels, hw, itemsize, vmem_cap):
    """Channel tile: multiple of 8 dividing C (or full C), sized to a generation-aware
    target (~8 MiB on 128-MiB-VMEM chips, ~4 MiB on 64-MiB chips) under an accurate
    padded-VMEM budget."""
    if channels % 8 != 0:
        # TODO(synk): spatial (H*W) tiling fallback when a full-C block overflows VMEM.
        return channels
    big_vmem = vmem_cap >= (100 << 20)               # v5e/v6e (128 MiB) vs v7x (64 MiB)
    target = (8 << 20) if big_vmem else (4 << 20)
    budget = int(vmem_cap * 0.55)
    divisors = [t for t in range(8, channels + 1, 8) if channels % t == 0]
    ct = divisors[0]
    for t in divisors:
        if (_padded_block_bytes(t, hw, itemsize) <= target
                and _vmem_need_bytes(t, hw, itemsize) <= budget):
            ct = t
    if not big_vmem:
        # 2-TensorCore generation: keep a few parallel grid steps for megacore sharding.
        # TODO(synk): manufacture steps via spatial (H*W) tiling instead of shrinking ct.
        while ct > divisors[0] and batch * (channels // ct) < 4:
            ct = max(t for t in divisors if t < ct)
    return ct


def _vmem_limit_bytes(need, vmem_cap):
    want = max(32 << 20, int(need * 1.25))
    return int(min(want, (vmem_cap * 3) // 4))


# ----------------------------------------------------------------------------- small-op glue
def _conv1d_same(x, w):
    """PyTorch Conv1d(1, 1, K, padding=K//2, bias=False) cross-correlation along the
    last axis of a (B, L) array. K is odd and tiny, so the loop is unrolled at trace time."""
    k = w.shape[0]
    p = k // 2
    xp = jnp.pad(x, ((0, 0), (p, p)))
    out = jnp.zeros_like(x)
    for j in range(k):
        out = out + w[j] * xp[:, j:j + x.shape[1]]
    return out


def _center_pad(w, k_max):
    p = (k_max - w.shape[0]) // 2
    return jnp.pad(w, (p, p))


def c_branch_kernel_size(channel):
    t = int(abs((math.log(channel, 2) + 1) / 2))
    return t if t % 2 else t + 1


def init_ms3da_params(key, channel):
    k = c_branch_kernel_size(channel)
    ks = jax.random.split(key, 9)
    return {
        "w_sp3": 0.3 * jax.random.normal(ks[0], (3,), jnp.float32),
        "w_sp5": 0.3 * jax.random.normal(ks[1], (5,), jnp.float32),
        "w_c3": 0.3 * jax.random.normal(ks[2], (3,), jnp.float32),
        "w_c5": 0.3 * jax.random.normal(ks[3], (5,), jnp.float32),
        "w_ck": 0.3 * jax.random.normal(ks[4], (k,), jnp.float32),
        "bn_gamma": 1.0 + 0.1 * jax.random.normal(ks[5], (channel,), jnp.float32),
        "bn_beta": 0.1 * jax.random.normal(ks[6], (channel,), jnp.float32),
        "bn_mean": 0.05 * jax.random.normal(ks[7], (channel,), jnp.float32),
        "bn_var": jnp.abs(1.0 + 0.1 * jax.random.normal(ks[8], (channel,), jnp.float32)),
    }


# ----------------------------------------------------------------------------- forward
def ms3da(x, params, eps=1e-5):
    """MS3DA forward (inference-mode BatchNorm). x: (B, C, H, W), returns same shape/dtype."""
    b, c, h, w = x.shape
    hw = h * w
    vmem_cap = _tpu_vmem_capacity()
    ct = _pick_c_tile(b, c, hw, x.dtype.itemsize, vmem_cap)
    grid = (b, c // ct)
    vmem_limit = _vmem_limit_bytes(_vmem_need_bytes(ct, hw, x.dtype.itemsize), vmem_cap)

    x_flat = x.reshape(b, c, hw)   # lane-dense view; free bitcast of contiguous NCHW

    # ---- pass 1: per-channel sums + channel-summed spatial map (Pallas) ---------------
    csum, colsum = pl.pallas_call(
        _pool_kernel,
        out_shape=(jax.ShapeDtypeStruct((b, c, 1), jnp.float32),
                   jax.ShapeDtypeStruct((b, 1, hw), jnp.float32)),
        grid_spec=pltpu.PrefetchScalarGridSpec(
            num_scalar_prefetch=0,
            grid=grid,
            in_specs=[pl.BlockSpec((None, ct, hw), lambda i, j: (i, j, 0))],
            out_specs=(pl.BlockSpec((None, ct, 1), lambda i, j: (i, j, 0)),
                       pl.BlockSpec((None, 1, hw), lambda i, j: (i, 0, 0)))),
        compiler_params=pltpu.CompilerParams(
            dimension_semantics=("parallel", "arbitrary"),   # channel axis accumulates
            vmem_limit_bytes=vmem_limit),
    )(x_flat)

    # ---- tiny glue in plain JAX (O(B*(C+H+W)) work) ------------------------------------
    # emb = channel-mean of [mean_W(x); mean_H(x)], then sp_branch (3 + 5 convs merged).
    col_mean = (colsum[:, 0, :] / c).reshape(b, h, w)               # mean over channels
    emb = jnp.concatenate([jnp.mean(col_mean, axis=2),               # mean_c(x_h) -> (B,H)
                           jnp.mean(col_mean, axis=1)], axis=1)      # mean_c(x_w) -> (B,W)
    w_sp = params["w_sp5"] + _center_pad(params["w_sp3"], 5)
    emb = _conv1d_same(emb, w_sp)
    h_emb, w_emb = emb[:, :h], emb[:, h:]
    sp = (h_emb[:, :, None] * w_emb[:, None, :]).reshape(b, 1, hw)   # (B, 1, H*W) f32

    # Channel credit: global-average descriptor -> c_branch (3 + 5 + k convs merged).
    c_desc = csum[:, :, 0] / hw                                      # (B, C)
    k_max = max(5, params["w_ck"].shape[0])
    w_c = (_center_pad(params["w_c3"], k_max) + _center_pad(params["w_c5"], k_max)
           + _center_pad(params["w_ck"], k_max))
    c_credit = _conv1d_same(c_desc, w_c)                             # (B, C)

    # Fold inference-mode BatchNorm2d into a per-(b, c) scale / shift.
    # TODO(synk): training-mode BatchNorm (batch statistics) not implemented.
    g = params["bn_gamma"] * jax.lax.rsqrt(params["bn_var"] + eps)   # (C,)
    scale = (c_credit * g[None, :])[:, :, None].astype(jnp.float32)  # (B, C, 1)
    shift = jnp.broadcast_to(
        (params["bn_beta"] - params["bn_mean"] * g)[None, :, None], (b, c, 1)
    ).astype(jnp.float32)

    # ---- pass 2: gated output on a lane-dense flattened H*W axis (Pallas) --------------
    # TODO(synk): optionally sweep pipeline_mode=pl.Buffered(3) on the x input for
    # 128-MiB-VMEM generations once headroom is confirmed.
    out = pl.pallas_call(
        _gate_kernel,
        out_shape=jax.ShapeDtypeStruct((b, c, hw), x.dtype),
        grid_spec=pltpu.PrefetchScalarGridSpec(
            num_scalar_prefetch=0,
            grid=grid,
            in_specs=[pl.BlockSpec((None, ct, hw), lambda i, j: (i, j, 0)),
                      pl.BlockSpec((None, 1, hw), lambda i, j: (i, 0, 0)),
                      pl.BlockSpec((None, ct, 1), lambda i, j: (i, j, 0)),
                      pl.BlockSpec((None, ct, 1), lambda i, j: (i, j, 0))],
            out_specs=pl.BlockSpec((None, ct, hw), lambda i, j: (i, j, 0))),
        input_output_aliases={0: 0},                 # gate x in place (x donated by caller)
        compiler_params=pltpu.CompilerParams(
            dimension_semantics=("parallel", "parallel"),
            vmem_limit_bytes=vmem_limit),
    )(x_flat, sp, scale, shift)

    return out.reshape(b, c, h, w)


# ----------------------------------------------------------------------------- reference
def _ms3da_ref(x, params, eps=1e-5):
    """Pure-JAX reference mirroring the PyTorch MS3DA.forward (training-mode branches,
    inference-mode BatchNorm)."""
    b, c, h, w = x.shape
    x_h = jnp.mean(x, axis=3)                          # pool_h           -> (B, C, H)
    x_w = jnp.mean(x, axis=2)                          # pool_w permuted  -> (B, C, W)
    out = jnp.concatenate([x_h, x_w], axis=2)          # (B, C, H+W)
    emb = jnp.mean(out, axis=1)                        # (B, H+W)
    emb = _conv1d_same(emb, params["w_sp3"]) + _conv1d_same(emb, params["w_sp5"])
    h_emb, w_emb = emb[:, :h], emb[:, h:]
    sp = h_emb[:, :, None] * w_emb[:, None, :]         # (B, H, W)
    c_credit = jnp.mean(x_h, axis=2)                   # avg_pool(x_h)    -> (B, C)
    c_credit = (_conv1d_same(c_credit, params["w_c3"])
                + _conv1d_same(c_credit, params["w_c5"])
                + _conv1d_same(c_credit, params["w_ck"]))
    z = sp[:, None, :, :] * c_credit[:, :, None, None]                     # (B, C, H, W)
    inv = jax.lax.rsqrt(params["bn_var"] + eps)
    zbn = ((z - params["bn_mean"][None, :, None, None])
           * (params["bn_gamma"] * inv)[None, :, None, None]
           + params["bn_beta"][None, :, None, None])
    return x * jax.nn.sigmoid(zbn)


if __name__ == "__main__":
    key = jax.random.PRNGKey(0)
    kx, kp = jax.random.split(key)
    B, C, H, W = 2, 4, 16, 16
    x = jax.random.normal(kx, (B, C, H, W), dtype=jnp.float32)
    params = init_ms3da_params(kp, C)

    # Reference first: x is donated to the kernel call (enables the in-place gate alias).
    ref = _ms3da_ref(x, params)
    out = jax.block_until_ready(jax.jit(ms3da, donate_argnums=(0,))(x, params))

    assert out.shape == ref.shape and out.dtype == ref.dtype
    assert jnp.allclose(out, ref, atol=2e-5, rtol=1e-5), float(jnp.max(jnp.abs(out - ref)))
    print("KERNEL_OK")
</pallas_src>

<mosaic_0001>
module attributes {stable_mosaic.version = 11 : i64} {
  func.func @_pool_kernel(%arg0: i32, %arg1: i32, %arg2: memref<1x4x256xf32, #tpu.memory_space<vmem>>, %arg3: memref<1x4x1xf32, #tpu.memory_space<vmem>>, %arg4: memref<1x1x256xf32, #tpu.memory_space<vmem>>) attributes {dimension_semantics = [#tpu.dimension_semantics<parallel>, #tpu.dimension_semantics<arbitrary>], iteration_bounds = array<i64: 2, 1>, scalar_prefetch = 0 : i64, scratch_operands = 0 : i64, tpu.core_type = #tpu.core_type<tc>, window_params = [{transform_indices = @transform_0, window_bounds = array<i64: 1, 4, 256>}, {transform_indices = @transform_1, window_bounds = array<i64: 1, 4, 1>}, {transform_indices = @transform_2, window_bounds = array<i64: 1, 1, 256>}]} {
    %c0 = arith.constant 0 : index
    %c0_0 = arith.constant 0 : index
    %c0_1 = arith.constant 0 : index
    %0 = vector.load %arg2[%c0, %c0_0, %c0_1] : memref<1x4x256xf32, #tpu.memory_space<vmem>>, vector<1x4x256xf32>
    %1 = vector.shape_cast %0 : vector<1x4x256xf32> to vector<4x256xf32>
    %cst = arith.constant dense<0.000000e+00> : vector<4xf32>
    %2 = vector.multi_reduction <add>, %1, %cst [1] : vector<4x256xf32> to vector<4xf32>
    %3 = vector.shape_cast %2 : vector<4xf32> to vector<4x1xf32>
    %c0_2 = arith.constant 0 : index
    %c0_3 = arith.constant 0 : index
    %c0_4 = arith.constant 0 : index
    %4 = vector.load %arg3[%c0_2, %c0_3, %c0_4] : memref<1x4x1xf32, #tpu.memory_space<vmem>>, vector<1x4x1xf32>
    %5 = vector.shape_cast %4 : vector<1x4x1xf32> to vector<4x1xf32>
    %6 = vector.shape_cast %3 : vector<4x1xf32> to vector<1x4x1xf32>
    tpu.vector_store %arg3[%c0_2, %c0_3, %c0_4], %6 {strides = array<i32>} : memref<1x4x1xf32, #tpu.memory_space<vmem>>, vector<1x4x1xf32>,
    %cst_5 = arith.constant dense<0.000000e+00> : vector<256xf32>
    %7 = vector.multi_reduction <add>, %1, %cst_5 [0] : vector<4x256xf32> to vector<256xf32>
    %8 = vector.shape_cast %7 : vector<256xf32> to vector<1x256xf32>
    %c0_i32 = arith.constant 0 : i32
    %9 = arith.cmpi eq, %arg1, %c0_i32 : i32
    %10 = arith.extui %9 : i1 to i32
    %c0_i32_6 = arith.constant 0 : i32
    %11 = arith.cmpi ne, %10, %c0_i32_6 : i32
    scf.if %11 {
      %c0_9 = arith.constant 0 : index
      %c0_10 = arith.constant 0 : index
      %c0_11 = arith.constant 0 : index
      %15 = vector.load %arg4[%c0_9, %c0_10, %c0_11] : memref<1x1x256xf32, #tpu.memory_space<vmem>>, vector<1x1x256xf32>
      %16 = vector.shape_cast %15 : vector<1x1x256xf32> to vector<1x256xf32>
      %17 = vector.shape_cast %8 : vector<1x256xf32> to vector<1x1x256xf32>
      tpu.vector_store %arg4[%c0_9, %c0_10, %c0_11], %17 {strides = array<i32>} : memref<1x1x256xf32, #tpu.memory_space<vmem>>, vector<1x1x256xf32>,
    } else {
    }
    %c0_i32_7 = arith.constant 0 : i32
    %12 = arith.cmpi sgt, %arg1, %c0_i32_7 : i32
    %13 = arith.extui %12 : i1 to i32
    %c0_i32_8 = arith.constant 0 : i32
    %14 = arith.cmpi ne, %13, %c0_i32_8 : i32
    scf.if %14 {
      %c0_9 = arith.constant 0 : index
      %c0_10 = arith.constant 0 : index
      %c0_11 = arith.constant 0 : index
      %15 = vector.load %arg4[%c0_9, %c0_10, %c0_11] : memref<1x1x256xf32, #tpu.memory_space<vmem>>, vector<1x1x256xf32>
      %16 = vector.shape_cast %15 : vector<1x1x256xf32> to vector<1x256xf32>
      %17 = arith.addf %16, %8 : vector<1x256xf32>
      %c0_12 = arith.constant 0 : index
      %c0_13 = arith.constant 0 : index
      %c0_14 = arith.constant 0 : index
      %18 = vector.load %arg4[%c0_12, %c0_13, %c0_14] : memref<1x1x256xf32, #tpu.memory_space<vmem>>, vector<1x1x256xf32>
      %19 = vector.shape_cast %18 : vector<1x1x256xf32> to vector<1x256xf32>
      %20 = vector.shape_cast %17 : vector<1x256xf32> to vector<1x1x256xf32>
      tpu.vector_store %arg4[%c0_12, %c0_13, %c0_14], %20 {strides = array<i32>} : memref<1x1x256xf32, #tpu.memory_space<vmem>>, vector<1x1x256xf32>,
    } else {
    }
    return
  }
  func.func @transform_0(%arg0: i32, %arg1: i32) -> (i32, i32, i32) {
    %c0_i32 = arith.constant 0 : i32
    %c0_i32_0 = arith.constant 0 : i32
    return %arg0, %arg1, %c0_i32 : i32, i32, i32
  }
  func.func @transform_1(%arg0: i32, %arg1: i32) -> (i32, i32, i32) {
    %c0_i32 = arith.constant 0 : i32
    %c0_i32_0 = arith.constant 0 : i32
    return %arg0, %arg1, %c0_i32 : i32, i32, i32
  }
  func.func @transform_2(%arg0: i32, %arg1: i32) -> (i32, i32, i32) {
    %c0_i32 = arith.constant 0 : i32
    %c0_i32_0 = arith.constant 0 : i32
    %c0_i32_1 = arith.constant 0 : i32
    return %arg0, %c0_i32, %c0_i32_0 : i32, i32, i32
  }
}

module attributes {stable_mosaic.version = 11 : i64} {
  func.func @_gate_kernel(%arg0: i32, %arg1: i32, %arg2: memref<1x4x256xf32, #tpu.memory_space<vmem>>, %arg3: memref<1x1x256xf32, #tpu.memory_space<vmem>>, %arg4: memref<1x4x1xf32, #tpu.memory_space<vmem>>, %arg5: memref<1x4x1xf32, #tpu.memory_space<vmem>>, %arg6: memref<1x4x256xf32, #tpu.memory_space<vmem>>) attributes {dimension_semantics = [#tpu.dimension_semantics<parallel>, #tpu.dimension_semantics<parallel>], iteration_bounds = array<i64: 2, 1>, scalar_prefetch = 0 : i64, scratch_operands = 0 : i64, tpu.core_type = #tpu.core_type<tc>, window_params = [{transform_indices = @transform_0, window_bounds = array<i64: 1, 4, 256>}, {transform_indices = @transform_1, window_bounds = array<i64: 1, 1, 256>}, {transform_indices = @transform_2, window_bounds = array<i64: 1, 4, 1>}, {transform_indices = @transform_3, window_bounds = array<i64: 1, 4, 1>}, {transform_indices = @transform_4, window_bounds = array<i64: 1, 4, 256>}]} {
    %c0 = arith.constant 0 : index
    %c0_0 = arith.constant 0 : index
    %c0_1 = arith.constant 0 : index
    %0 = vector.load %arg4[%c0, %c0_0, %c0_1] : memref<1x4x1xf32, #tpu.memory_space<vmem>>, vector<1x4x1xf32>
    %1 = vector.shape_cast %0 : vector<1x4x1xf32> to vector<4x1xf32>
    %c0_2 = arith.constant 0 : index
    %c0_3 = arith.constant 0 : index
    %c0_4 = arith.constant 0 : index
    %2 = vector.load %arg3[%c0_2, %c0_3, %c0_4] : memref<1x1x256xf32, #tpu.memory_space<vmem>>, vector<1x1x256xf32>
    %3 = vector.shape_cast %2 : vector<1x1x256xf32> to vector<1x256xf32>
    %4 = vector.broadcast %1 : vector<4x1xf32> to vector<4x256xf32>
    %5 = vector.broadcast %3 : vector<1x256xf32> to vector<4x256xf32>
    %6 = arith.mulf %4, %5 : vector<4x256xf32>
    %c0_5 = arith.constant 0 : index
    %c0_6 = arith.constant 0 : index
    %c0_7 = arith.constant 0 : index
    %7 = vector.load %arg5[%c0_5, %c0_6, %c0_7] : memref<1x4x1xf32, #tpu.memory_space<vmem>>, vector<1x4x1xf32>
    %8 = vector.shape_cast %7 : vector<1x4x1xf32> to vector<4x1xf32>
    %9 = vector.broadcast %8 : vector<4x1xf32> to vector<4x256xf32>
    %10 = arith.addf %6, %9 : vector<4x256xf32>
    %11 = arith.negf %10 : vector<4x256xf32>
    %12 = math.exp %11 : vector<4x256xf32>
    %cst = arith.constant 1.000000e+00 : f32
    %13 = vector.broadcast %cst : f32 to vector<4x256xf32>
    %14 = arith.addf %13, %12 : vector<4x256xf32>
    %15 = arith.divf %13, %14 : vector<4x256xf32>
    %c0_8 = arith.constant 0 : index
    %c0_9 = arith.constant 0 : index
    %c0_10 = arith.constant 0 : index
    %16 = vector.load %arg2[%c0_8, %c0_9, %c0_10] : memref<1x4x256xf32, #tpu.memory_space<vmem>>, vector<1x4x256xf32>
    %17 = vector.shape_cast %16 : vector<1x4x256xf32> to vector<4x256xf32>
    %18 = arith.mulf %17, %15 : vector<4x256xf32>
    %c0_11 = arith.constant 0 : index
    %c0_12 = arith.constant 0 : index
    %c0_13 = arith.constant 0 : index
    %19 = vector.load %arg6[%c0_11, %c0_12, %c0_13] : memref<1x4x256xf32, #tpu.memory_space<vmem>>, vector<1x4x256xf32>
    %20 = vector.shape_cast %19 : vector<1x4x256xf32> to vector<4x256xf32>
    %21 = vector.shape_cast %18 : vector<4x256xf32> to vector<1x4x256xf32>
    tpu.vector_store %arg6[%c0_11, %c0_12, %c0_13], %21 {strides = array<i32>} : memref<1x4x256xf32, #tpu.memory_space<vmem>>, vector<1x4x256xf32>,
    return
  }
  func.func @transform_0(%arg0: i32, %arg1: i32) -> (i32, i32, i32) {
    %c0_i32 = arith.constant 0 : i32
    %c0_i32_0 = arith.constant 0 : i32
    return %arg0, %arg1, %c0_i32 : i32, i32, i32
  }
  func.func @transform_1(%arg0: i32, %arg1: i32) -> (i32, i32, i32) {
    %c0_i32 = arith.constant 0 : i32
    %c0_i32_0 = arith.constant 0 : i32
    %c0_i32_1 = arith.constant 0 : i32
    return %arg0, %c0_i32, %c0_i32_0 : i32, i32, i32
  }
  func.func @transform_2(%arg0: i32, %arg1: i32) -> (i32, i32, i32) {
    %c0_i32 = arith.constant 0 : i32
    %c0_i32_0 = arith.constant 0 : i32
    return %arg0, %arg1, %c0_i32 : i32, i32, i32
  }
  func.func @transform_3(%arg0: i32, %arg1: i32) -> (i32, i32, i32) {
    %c0_i32 = arith.constant 0 : i32
    %c0_i32_0 = arith.constant 0 : i32
    return %arg0, %arg1, %c0_i32 : i32, i32, i32
  }
  func.func @transform_4(%arg0: i32, %arg1: i32) -> (i32, i32, i32) {
    %c0_i32 = arith.constant 0 : i32
    %c0_i32_0 = arith.constant 0 : i32
    return %arg0, %arg1, %c0_i32 : i32, i32, i32
  }
}

</mosaic_0001>

<bundles_post_ra>
// kernel: ms3da.2
= control target key start
LH: loop header
LB: loop body
LE: loop exit
PB: predicated region body
PF: predicated region fallthrough
CT: control target
= control target key end

     0   :  { %s456_s9 = smov 0   ;;  %s458_s10 = smov 0   ;;  %s497_s0 = inlined_call_operand.vmem [shape: f32[2,4,256], index: 0, kind: input, shape index: {}]   ;;  %s498_s1 = inlined_call_operand.vmem [shape: f32[2,4,1], index: 1, kind: output, shape index: {0}]   ;;  %s499_s2 = inlined_call_operand.vmem [shape: f32[2,1,256], index: 2, kind: output, shape index: {1}]  }
   0x1   :  { %s460_s11 = smov 0  }
   0x2 LB: > { %s25_s12 = sadd.s32 1, %s434_s10  ;;  %p382_p0 = scmp.ge.s32.totalorder %s438_s11, 1  ;;  %s438_s11 = sphi %s460_s11, %s13_s11   ;;  %s434_s10 = sphi %s458_s10, %s501_s10   ;;  %s430_s9 = sphi %s456_s9, %s500_s9  }
   0x3   : > { %p27_p1 = scmp.ge.s32.totalorder %s25_s12, 2  ;;  %p135_p2 = scmp.lt.s32.totalorder %s438_s11, 3 }
   0x5   : > { %s503_s12 = smov (%p27_p1, %s25_s12), 0  ;;  %p136_p3 = pnand %p382_p0, %p135_p2 }
   0x6   : > { %p167_p4 = scmp.lt.s32.totalorder (!%p136_p3), %s430_s9, 1  ;;  %vm191_vm0 = vcmask (!%p136_p3), 1043456   ;;  %v440_v10 = vmov (!%p136_p3), 1966171168   ;;  %v221_v12 = vlaneseq (!%p136_p3)  ;;  %vm197_vm2 = vcmask (!%p136_p3), 3072  }
   0x7   : > { %139 = sbr.rel (%p136_p3) target bundleno = 166 (0xa6), region = 24  ;;  %v219_v11 = vunpack.c.l.s4 (!%p136_p3), %v440_v10 }
   0x8   : > { %v222_v18 = vshrl.u32 (!%p136_p3), %v221_v12, 7  ;;  %vm235_vm1 = vcmp.lt.s32.totalorder (!%p136_p3), %v221_v12, 256 }
   0x9   : > { %v220_v17 = vunpack.c.0.s8 (!%p136_p3), %v219_v11 }
   0xb   : > { %v223_v22 = vsub.s32 (!%p136_p3), %v220_v17, %v222_v18 }
   0xe   : > { %s505_s9 = smov (!%p167_p4, %s430_s9), 1 }
   0xf   : > { %s389_s13 = sshll.u32 %s505_s9, 3  ;;  %s386_s17 = sshll.u32 %s505_s9, 1 }
  0x10   : > { %s175_s16 = scalar_lea.vmem %s497_s0, %s389_s13  ;;  %s186_s20 = scalar_lea.vmem %s499_s2, %s386_s17 }
  0x11   : > { %v187_v0 = vld [vmem:[%s175_s16] sm:$0xff]  ;;  %s385_s21 = sshll.u32 %s505_s9, 2 }
  0x12   : > { %v189_v1 = vcombine.high %v187_v0, %v187_v0  ;;  %v192_v2 = vsel %vm191_vm0, %v187_v0, 0.0  ;;  %s182_s24 = scalar_lea.vmem %s498_s1, %s385_s21 }
  0x13   : > { %v199_v3 = vrot.slane %v192_v2, 4 }
  0x14   : > { %v193_v4 = vsel %vm191_vm0, %v189_v1, 0.0 }
  0x15   : > { %v194_v5 = vadd.f32 %v193_v4, %v192_v2  ;;  %v200_v6 = vadd.f32 %v199_v3, %v192_v2  ;;  %v205_v7 = vrot.slane %v193_v4, 4 }
  0x17   : > { %195 = vadd.xlane.f32.xlu0 %v194_v5  ;;  %v201_v8 = vrot.slane %v200_v6, 2  ;;  %v206_v9 = vadd.f32 %v205_v7, %v193_v4 }
  0x19   : > { %v202_v13 = vadd.f32 %v201_v8, %v200_v6  ;;  %v207_v14 = vrot.slane %v206_v9, 2 }
  0x1b   : > { %v203_v15 = vrot.slane %v202_v13, 1  ;;  %v208_v16 = vadd.f32 %v207_v14, %v206_v9 }
  0x1d   : > { %v204_v19 = vadd.f32 %v203_v15, %v202_v13  ;;  %v209_v20 = vrot.slane %v208_v16, 1 }
  0x1f   : > { %v210_v21 = vadd.f32 %v209_v20, %v208_v16 }
  0x21   : > { %v217_v23 = vcombine.low %v204_v19, %v210_v21 }
  0x23   : > { %v224_v24 = vrot.slane %v217_v23, %v223_v22 }
  0x25   : > { %v231_v25 = vrot.slane %v224_v24, %v223_v22 }
  0x27   : > { %237 = vst.msk [vmem:[%s186_s20] sm:$0x3] %vm235_vm1, %v231_v25 }
  0xa4   : > { %v196_v26 = vpop.xlane.xlu0 %195 }
  0xa5   : > { %198 = vst.msk [vmem:[%s182_s24] sm:$0xf] %vm197_vm2, %v196_v26 }
  0xa6 PF: > { %s13_s11 = sadd.s32 1, %s438_s11   ;;  %s500_s9 = smov %s434_s10 }
  0xa7   : > { %p10_p5 = scmp.ge.s32.totalorder %s13_s11, 4   ;;  %s501_s10 = smov %s503_s12 }
  0xa9   :  { %12 = sbr.rel (!%p10_p5) target bundleno = 2 (0x2), region = 74 }

// kernel: ms3da.3
= control target key start
LH: loop header
LB: loop body
LE: loop exit
PB: predicated region body
PF: predicated region fallthrough
CT: control target
= control target key end

     0   :  { %s590_s15 = smov 0   ;;  %s592_s16 = smov 0   ;;  %s637_s0 = inlined_call_operand.vmem [shape: f32[2,4,256], index: 0, kind: input, shape index: {}, may-alias: {0,4}]   ;;  %s638_s1 = inlined_call_operand.vmem [shape: f32[2,1,256], index: 1, kind: input, shape index: {}]   ;;  %s639_s2 = inlined_call_operand.vmem [shape: f32[2,4,1], index: 2, kind: input, shape index: {}]   ;;  %s640_s3 = inlined_call_operand.vmem [shape: f32[2,4,1], index: 3, kind: input, shape index: {}]   ;;  %s641_s4 = inlined_call_operand.vmem [shape: f32[2,4,256], index: 4, kind: output, shape index: {}, may-alias: {0,4}]  }
   0x1   :  { %s594_s17 = smov 0  }
   0x2 LB: > { %s26_s18 = sadd.s32 1, %s558_s16  ;;  %p492_p0 = scmp.ge.s32.totalorder %s562_s17, 1  ;;  %s562_s17 = sphi %s594_s17, %s14_s17   ;;  %s558_s16 = sphi %s592_s16, %s643_s16   ;;  %s554_s15 = sphi %s590_s15, %s642_s15  }
   0x3   : > { %p28_p1 = scmp.ge.s32.totalorder %s26_s18, 2  ;;  %p219_p2 = scmp.lt.s32.totalorder %s562_s17, 3 }
   0x5   : > { %s645_s18 = smov (%p28_p1, %s26_s18), 0  ;;  %p220_p3 = pnand %p492_p0, %p219_p2 }
   0x6   : > { %p271_p4 = scmp.lt.s32.totalorder (!%p220_p3), %s554_s15, 1  ;;  %v564_v0 = vmov (!%p220_p3), 0   ;;  %v315_v3 = vlaneseq (!%p220_p3) }
   0x7   : > { %223 = sbr.rel (%p220_p3) target bundleno = 184 (0xb8), region = 36  ;;  %531 = vset.pattern.permute.xlu0 (!%p220_p3), %v564_v0 }
   0x8   : > { %v316_v4 = vshrl.u32 (!%p220_p3), %v315_v3, 7 }
   0xa   : > { %v317_v5 = vsub.s32 (!%p220_p3), 0, %v316_v4  ;;  %v321_v6 = vsub.s32 (!%p220_p3), 1, %v316_v4 }
   0xe   : > { %s647_s15 = smov (!%p271_p4, %s554_s15), 1 }
   0xf   : > { %s496_s19 = sshll.u32 %s647_s15, 2  ;;  %s495_s26 = sshll.u32 %s647_s15, 1 }
  0x10   : > { %s290_s22 = scalar_lea.vmem %s639_s2, %s496_s19  ;;  %s297_s25 = scalar_lea.vmem %s640_s3, %s496_s19 }
  0x11   : > { %v307_v1 = vld [vmem:[%s290_s22] sm:$0xf]  ;;  %s283_s29 = scalar_lea.vmem %s638_s1, %s495_s26  ;;  %s504_s30 = sshll.u32 %s647_s15, 3 }
  0x12   : > { %311 = vperm.xlu0 %531, %v307_v1   ;;  %v327_v2 = vld [vmem:[%s297_s25] sm:$0xf]  ;;  %s279_s7 = scalar_lea.vmem %s637_s0, %s504_s30  ;;  %s306_s10 = scalar_lea.vmem %s641_s4, %s504_s30 }
  0x13   : > { %v308_v7 = vld [vmem:[%s283_s29] sm:$0x3] }
  0x14   : > { %v318_v8 = vrot.slane %v308_v7, %v317_v5  ;;  %v322_v9 = vrot.slane %v308_v7, %v321_v6  ;;  %v347_v24 = vld [vmem:[%s279_s7] sm:$0xff] }
  0x16   : > { %330 = vperm.xlu0 %531, %v327_v2  }
  0x91   : > { %v312_v10 = vpop.permute.xlu0 %311 }
  0x92   : > { %v325_v11 = vmul.f32 %v318_v8, %v312_v10  ;;  %v326_v12 = vmul.f32 %v322_v9, %v312_v10 }
  0x95   : > { %v331_v13 = vpop.permute.xlu0 %330 }
  0x96   : > { %v333_v14 = vadd.f32 %v331_v13, %v325_v11  ;;  %v334_v15 = vadd.f32 %v331_v13, %v326_v12 }
  0x98   : > { %v500_v16 = vmul.f32 -1.442695, %v333_v14  ;;  %v501_v17 = vmul.f32 -1.442695, %v334_v15 }
  0x9a   : > { %532 = vpow2.f32 %v500_v16 }
  0x9b   : > { %534 = vpow2.f32 %v501_v17 }
  0xa4   : > { %v533_v18 = vpop.eup %532 }
  0xa5   : > { %v535_v19 = vpop.eup %534  ;;  %v341_v20 = vadd.f32 1.0, %v533_v18 }
  0xa6   : > { %v342_v21 = vadd.f32 1.0, %v535_v19 }
  0xa7   : > { %536 = vrcp.f32 %v341_v20 }
  0xa8   : > { %538 = vrcp.f32 %v342_v21 }
  0xb1   : > { %v537_v22 = vpop.eup %536 }
  0xb2   : > { %v539_v23 = vpop.eup %538 }
  0xb3   : > { %v350_v25 = vcombine.low %v537_v22, %v539_v23 }
  0xb5   : > { %v352_v26 = vmul.f32 %v350_v25, %v347_v24 }
  0xb7   : > { %353 = vst [vmem:[%s306_s10] sm:$0xff] %v352_v26 }
  0xb8 PF: > { %s14_s17 = sadd.s32 1, %s562_s17   ;;  %s642_s15 = smov %s558_s16 }
  0xb9   : > { %p11_p5 = scmp.ge.s32.totalorder %s14_s17, 4   ;;  %s643_s16 = smov %s645_s18 }
  0xbb   :  { %13 = sbr.rel (!%p11_p5) target bundleno = 2 (0x2), region = 75 }

</bundles_post_ra>
